<compile_context>
chip_gen: v7x
topology: tpu7x:2x2x1
jax: 0.10.0
libtpu: 0.0.40
codegen_flags: <defaults>
</compile_context>

<pallas_src>
import functools

import jax
import jax.numpy as jnp
from jax import lax
from jax.experimental import pallas as pl
from jax.experimental.pallas import tpu as pltpu

_LANES = 128
_SUBLANES = 8
_ACC_ROWS = 256          # wide accumulator: 32 independent vreg rows
_NUM_SLICES = 2          # leading 'parallel' grid axis (v7x 2-TC split)


def _l1_kernel(x_ref, y_ref, o_ref, *, rows, block_rows, acc_rows):
    c = pl.program_id(0)
    i = pl.program_id(1)
    steps = pl.num_programs(1)

    # Output block is resident across the i axis (same block index for all i);
    # accumulate directly into it (no scratch), zero it on the first step.
    @pl.when(i == 0)
    def _():
        o_ref[...] = jnp.zeros_like(o_ref)

    # Per-tile f32 cast + |x - y|.  Kernel is memory-bound; VPU has slack.
    d = jnp.abs(x_ref[...].astype(jnp.float32) - y_ref[...].astype(jnp.float32))

    # Scalar bookkeeping in units of rows only (no per-element flat index ->
    # no int32 overflow for huge tensors).
    b = c * steps + i                 # unclamped logical block index
    valid = rows - b * block_rows     # rows of this block holding real data
    groups = block_rows // acc_rows

    @pl.when(valid >= block_rows)
    def _interior():
        # Full interior block: mask-free streaming accumulate into the wide
        # accumulator.  Reshape is a sublane-grouped view (no data movement).
        o_ref[...] += jnp.sum(d.reshape(groups, acc_rows, _LANES), axis=0)

    @pl.when(valid < block_rows)
    def _edge():
        # Partial edge block or phantom step of the parallel split.
        # Mask with block-local row indices (small ints) vs. the scalar
        # `valid`; for phantom steps valid <= 0 so everything is dropped.
        row = lax.broadcasted_iota(jnp.int32, (acc_rows, _LANES), 0)
        acc = jnp.zeros((acc_rows, _LANES), jnp.float32)
        for g in range(groups):       # static unroll; cold path, runs <= twice
            keep = (row + g * acc_rows) < valid
            acc = acc + jnp.where(
                keep, d[g * acc_rows:(g + 1) * acc_rows, :], jnp.float32(0.0))
        o_ref[...] += acc


def _vmem_capacity_bytes():
    try:
        return int(pltpu.get_tpu_info().vmem_capacity_bytes)
    except Exception:
        return 64 * 1024 * 1024   # conservative: v7x per-TC physical VMEM


def l1_loss_pallas(x, target):
    """mean(|x - target|) computed in a Pallas TPU kernel. Returns f32 scalar."""
    assert x.shape == target.shape, "l1_loss requires matching shapes"
    n = x.size
    assert n > 0

    # Flatten in native dtype (ravel of a contiguous array is free).
    xf = jnp.ravel(x)
    yf = jnp.ravel(target)

    rows_all = n // _LANES            # full lane-aligned rows available
    itemsize = max(x.dtype.itemsize, target.dtype.itemsize)
    # ~4 MiB per input block for <=4-byte dtypes (8192 rows f32); the f32
    # intermediate adds another ~4 MiB.  Multiple of _ACC_ROWS by construction.
    block_rows_target = 8192 if itemsize <= 4 else 4096

    # Choose acc_rows / block_rows so the block never exceeds the array:
    #  * rows >= 256: block is a multiple of 256 that fits inside rows; the
    #    last block may be partial (masked in-kernel).
    #  * 8 <= rows < 256: a single exact block over the sublane-aligned prefix.
    #  * rows < 8: too small to bother -- pure-jnp fallback.
    if rows_all >= _ACC_ROWS:
        acc_rows = _ACC_ROWS
        block_rows = min(block_rows_target, (rows_all // _ACC_ROWS) * _ACC_ROWS)
        rows = rows_all
    elif rows_all >= _SUBLANES:
        acc_rows = (rows_all // _SUBLANES) * _SUBLANES
        block_rows = acc_rows
        rows = acc_rows
    else:
        acc_rows = block_rows = rows = 0

    total = jnp.float32(0.0)
    n_kernel = rows * _LANES          # elements handled by the kernel

    if rows > 0:
        if n_kernel != n:
            # TODO(synk): 1-D BlockSpec path would avoid this bulk slice copy.
            xb = lax.slice(xf, (0,), (n_kernel,))
            yb = lax.slice(yf, (0,), (n_kernel,))
        else:
            xb, yb = xf, yf
        xb = xb.reshape(rows, _LANES)
        yb = yb.reshape(rows, _LANES)

        num_blocks = pl.cdiv(rows, block_rows)
        num_slices = min(_NUM_SLICES, num_blocks)
        steps = pl.cdiv(num_blocks, num_slices)

        def in_map(c, i):
            # Clamp phantom blocks (c*steps + i >= num_blocks) onto the last
            # real block so the DMA stays in-bounds; the in-kernel mask zeroes
            # their contribution.
            return (jnp.minimum(c * steps + i, num_blocks - 1), 0)

        kernel = functools.partial(
            _l1_kernel, rows=rows, block_rows=block_rows, acc_rows=acc_rows)

        # Explicit scoped-VMEM budget: 2 inputs x 2 pipeline buffers + the f32
        # |diff| intermediate + generous headroom, capped below physical VMEM.
        in_block_bytes = block_rows * _LANES * itemsize
        d_bytes = block_rows * _LANES * 4
        vmem_limit = 4 * in_block_bytes + 2 * d_bytes + (16 << 20)
        vmem_limit = max(vmem_limit, 16 << 20)
        vmem_limit = min(vmem_limit, (3 * _vmem_capacity_bytes()) // 4)

        partials = pl.pallas_call(
            kernel,
            out_shape=jax.ShapeDtypeStruct(
                (num_slices * acc_rows, _LANES), jnp.float32),
            grid_spec=pltpu.PrefetchScalarGridSpec(
                num_scalar_prefetch=0,
                grid=(num_slices, steps),
                in_specs=[
                    pl.BlockSpec((block_rows, _LANES), in_map),
                    pl.BlockSpec((block_rows, _LANES), in_map),
                ],
                out_specs=pl.BlockSpec((acc_rows, _LANES), lambda c, i: (c, 0)),
            ),
            compiler_params=pltpu.CompilerParams(
                dimension_semantics=("parallel", "arbitrary"),
                vmem_limit_bytes=int(vmem_limit),
            ),
            cost_estimate=pl.CostEstimate(
                flops=4 * n,
                transcendentals=0,
                bytes_accessed=x.nbytes + target.nbytes
                + num_slices * acc_rows * _LANES * 4,
            ),
        )(xb, yb)

        # Single cheap final reduction of the per-slice wide partial sums.
        total = total + jnp.sum(partials)

    if n_kernel != n:
        # Remainder (< 1024 elements: sub-block rows and/or <128-elem lane
        # tail): tiny jnp expression, no full-array pad / extra HBM pass.
        xt = lax.slice(xf, (n_kernel,), (n,)).astype(jnp.float32)
        yt = lax.slice(yf, (n_kernel,), (n,)).astype(jnp.float32)
        total = total + jnp.sum(jnp.abs(xt - yt))

    return total / jnp.float32(n)


def l1_loss_module(inputs, target):
    """Mirror of the PyTorch L1Loss module: uses the LAST tensor in `inputs`."""
    return l1_loss_pallas(inputs[-1], target)


if __name__ == "__main__":
    key = jax.random.PRNGKey(0)
    k1, k2, k3 = jax.random.split(key, 3)

    # `inputs` is a list of feature maps (NCHW); the loss uses inputs[-1].
    x0 = jax.random.normal(k1, (2, 4, 8, 8), dtype=jnp.float32)      # ignored
    x1 = jax.random.normal(k2, (2, 4, 16, 16), dtype=jnp.float32)    # used
    target = jax.random.normal(k3, (2, 4, 16, 16), dtype=jnp.float32)

    loss = l1_loss_module([x0, x1], target)
    loss = jax.block_until_ready(loss)

    ref = jnp.mean(jnp.abs(x1 - target))
    assert jnp.allclose(loss, ref, rtol=1e-5, atol=1e-6), (loss, ref)

    # Extra check: lane-misaligned size exercising the partial-edge masked
    # path, the 2-way parallel split, and the wrapper tail fold.
    k4, k5 = jax.random.split(k3)
    xm = jax.random.normal(k4, (2, 4, 300, 17), dtype=jnp.float32)   # n = 40800
    ym = jax.random.normal(k5, (2, 4, 300, 17), dtype=jnp.float32)
    lm = jax.block_until_ready(l1_loss_pallas(xm, ym))
    refm = jnp.mean(jnp.abs(xm - ym))
    assert jnp.allclose(lm, refm, rtol=1e-5, atol=1e-6), (lm, refm)

    print("KERNEL_OK")
</pallas_src>

<mosaic_0001>
module attributes {stable_mosaic.version = 11 : i64} {
  func.func @_l1_kernel(%arg0: i32, %arg1: i32, %arg2: memref<16x128xf32, #tpu.memory_space<vmem>>, %arg3: memref<16x128xf32, #tpu.memory_space<vmem>>, %arg4: memref<16x128xf32, #tpu.memory_space<vmem>>) attributes {dimension_semantics = [#tpu.dimension_semantics<parallel>, #tpu.dimension_semantics<arbitrary>], iteration_bounds = array<i64: 1, 1>, scalar_prefetch = 0 : i64, scratch_operands = 0 : i64, tpu.core_type = #tpu.core_type<tc>, window_params = [{transform_indices = @transform_0, window_bounds = array<i64: 16, 128>}, {transform_indices = @transform_1, window_bounds = array<i64: 16, 128>}, {transform_indices = @transform_2, window_bounds = array<i64: 16, 128>}]} {
    %c0_i32 = arith.constant 0 : i32
    %0 = arith.cmpi eq, %arg1, %c0_i32 : i32
    %1 = arith.extui %0 : i1 to i32
    %c0_i32_0 = arith.constant 0 : i32
    %2 = arith.cmpi ne, %1, %c0_i32_0 : i32
    scf.if %2 {
      %cst = arith.constant 0.000000e+00 : f32
      %17 = vector.broadcast %cst : f32 to vector<16x128xf32>
      %c0_9 = arith.constant 0 : index
      %c0_10 = arith.constant 0 : index
      %18 = vector.load %arg4[%c0_9, %c0_10] : memref<16x128xf32, #tpu.memory_space<vmem>>, vector<16x128xf32>
      tpu.vector_store %arg4[%c0_9, %c0_10], %17 {strides = array<i32>} : memref<16x128xf32, #tpu.memory_space<vmem>>, vector<16x128xf32>,
    } else {
    }
    %c0 = arith.constant 0 : index
    %c0_1 = arith.constant 0 : index
    %3 = vector.load %arg2[%c0, %c0_1] : memref<16x128xf32, #tpu.memory_space<vmem>>, vector<16x128xf32>
    %c0_2 = arith.constant 0 : index
    %c0_3 = arith.constant 0 : index
    %4 = vector.load %arg3[%c0_2, %c0_3] : memref<16x128xf32, #tpu.memory_space<vmem>>, vector<16x128xf32>
    %5 = arith.subf %3, %4 : vector<16x128xf32>
    %6 = math.absf %5 : vector<16x128xf32>
    %c1_i32 = arith.constant 1 : i32
    %7 = arith.muli %arg0, %c1_i32 : i32
    %8 = arith.addi %7, %arg1 : i32
    %c16_i32 = arith.constant 16 : i32
    %9 = arith.muli %8, %c16_i32 : i32
    %c16_i32_4 = arith.constant 16 : i32
    %10 = arith.subi %c16_i32_4, %9 : i32
    %c16_i32_5 = arith.constant 16 : i32
    %11 = arith.cmpi sge, %10, %c16_i32_5 : i32
    %12 = arith.extui %11 : i1 to i32
    %c0_i32_6 = arith.constant 0 : i32
    %13 = arith.cmpi ne, %12, %c0_i32_6 : i32
    scf.if %13 {
      %c0_9 = arith.constant 0 : index
      %c0_10 = arith.constant 0 : index
      %17 = vector.load %arg4[%c0_9, %c0_10] : memref<16x128xf32, #tpu.memory_space<vmem>>, vector<16x128xf32>
      %18 = vector.shape_cast %6 : vector<16x128xf32> to vector<1x16x128xf32>
      %cst = arith.constant dense<0.000000e+00> : vector<16x128xf32>
      %19 = vector.multi_reduction <add>, %18, %cst [0] : vector<1x16x128xf32> to vector<16x128xf32>
      %20 = arith.addf %17, %19 : vector<16x128xf32>
      %c0_11 = arith.constant 0 : index
      %c0_12 = arith.constant 0 : index
      %21 = vector.load %arg4[%c0_11, %c0_12] : memref<16x128xf32, #tpu.memory_space<vmem>>, vector<16x128xf32>
      tpu.vector_store %arg4[%c0_11, %c0_12], %20 {strides = array<i32>} : memref<16x128xf32, #tpu.memory_space<vmem>>, vector<16x128xf32>,
    } else {
    }
    %c16_i32_7 = arith.constant 16 : i32
    %14 = arith.cmpi slt, %10, %c16_i32_7 : i32
    %15 = arith.extui %14 : i1 to i32
    %c0_i32_8 = arith.constant 0 : i32
    %16 = arith.cmpi ne, %15, %c0_i32_8 : i32
    scf.if %16 {
      %17 = tpu.iota {dimensions = array<i32: 0>} : vector<16x128xi32>
      %cst = arith.constant 0.000000e+00 : f32
      %18 = vector.broadcast %cst : f32 to vector<16x128xf32>
      %c0_i32_9 = arith.constant 0 : i32
      %19 = vector.broadcast %c0_i32_9 : i32 to vector<16x128xi32>
      %20 = arith.addi %17, %19 : vector<16x128xi32>
      %21 = vector.broadcast %10 : i32 to vector<16x128xi32>
      %22 = arith.cmpi slt, %20, %21 : vector<16x128xi32>
      %cst_10 = arith.constant 0.000000e+00 : f32
      %23 = vector.broadcast %cst_10 : f32 to vector<16x128xf32>
      %24 = arith.select %22, %6, %23 : vector<16x128xi1>, vector<16x128xf32>
      %25 = arith.addf %18, %24 : vector<16x128xf32>
      %c0_11 = arith.constant 0 : index
      %c0_12 = arith.constant 0 : index
      %26 = vector.load %arg4[%c0_11, %c0_12] : memref<16x128xf32, #tpu.memory_space<vmem>>, vector<16x128xf32>
      %27 = arith.addf %26, %25 : vector<16x128xf32>
      %c0_13 = arith.constant 0 : index
      %c0_14 = arith.constant 0 : index
      %28 = vector.load %arg4[%c0_13, %c0_14] : memref<16x128xf32, #tpu.memory_space<vmem>>, vector<16x128xf32>
      tpu.vector_store %arg4[%c0_13, %c0_14], %27 {strides = array<i32>} : memref<16x128xf32, #tpu.memory_space<vmem>>, vector<16x128xf32>,
    } else {
    }
    return
  }
  func.func @transform_0(%arg0: i32, %arg1: i32) -> (i32, i32) {
    %c1_i32 = arith.constant 1 : i32
    %0 = arith.muli %arg0, %c1_i32 : i32
    %1 = arith.addi %0, %arg1 : i32
    %c0_i32 = arith.constant 0 : i32
    %2 = arith.minsi %1, %c0_i32 : i32
    %c0_i32_0 = arith.constant 0 : i32
    %c0_i32_1 = arith.constant 0 : i32
    return %2, %c0_i32_0 : i32, i32
  }
  func.func @transform_1(%arg0: i32, %arg1: i32) -> (i32, i32) {
    %c1_i32 = arith.constant 1 : i32
    %0 = arith.muli %arg0, %c1_i32 : i32
    %1 = arith.addi %0, %arg1 : i32
    %c0_i32 = arith.constant 0 : i32
    %2 = arith.minsi %1, %c0_i32 : i32
    %c0_i32_0 = arith.constant 0 : i32
    %c0_i32_1 = arith.constant 0 : i32
    return %2, %c0_i32_0 : i32, i32
  }
  func.func @transform_2(%arg0: i32, %arg1: i32) -> (i32, i32) {
    %c0_i32 = arith.constant 0 : i32
    %c0_i32_0 = arith.constant 0 : i32
    return %arg0, %c0_i32 : i32, i32
  }
}

</mosaic_0001>

<bundles_post_ra>
// kernel: tpu_custom_call.1
= control target key start
LH: loop header
LB: loop body
LE: loop exit
PB: predicated region body
PF: predicated region fallthrough
CT: control target
= control target key end

     0   :  { %7 = vsyncpa [#allocation3], 0  ;;  %s274_s0 = inlined_call_operand.hbm [shape: f32[16,128], index: 0, kind: input, shape index: {}]   ;;  %s275_s1 = inlined_call_operand.hbm [shape: f32[16,128], index: 1, kind: input, shape index: {}]   ;;  %s276_s2 = inlined_call_operand.hbm [shape: f32[16,128], index: 2, kind: output, shape index: {}]  }
   0x1   :  { %8 = vsyncpa [#allocation6], 0 }
   0x2   :  { %9 = vsyncpa [#allocation4], 0  ;;  %s209_s9 = smov [#allocation2]   ;;  %s137_s13 = scalar_lea.hbm %s274_s0, 256 }
   0x3   :  { %s21_s10 = sshll.u32 %s209_s9, 4  ;;  %p138_p0 = scmp.ne.s32.totalorder %s274_s0, %s137_s13  ;;  %s22_s10 = int_to_ptr.vmem [resolvable:$true] %s21_s10 }
   0x4   :  { %p141_p1 = scmp.lt.u32.totalorder %s137_s13, %s274_s0 }
   0x6   :  { %p143_p2 = pnand %p141_p1, %p138_p0 }
   0x8   :  { %146 = shalt.err (!%p143_p2)
}
   0x9   :  { %s147_s18 = scalar_lea.vmem %s22_s10, 256  ;;  %p152_p4 = scmp.lt.s32.totalorder %s22_s10, %s22_s10 }
   0xa   :  { %p148_p3 = scmp.ne.s32.totalorder %s22_s10, %s147_s18  ;;  %p153_p5 = scmp.lt.s32.totalorder %s147_s18, %s147_s18 }
   0xc   :  { %p154_p6 = por %p153_p5, %p152_p4 }
   0xe   :  { %p155_p7 = pnand %p154_p6, %p148_p3 }
  0x10   :  { %158 = shalt.err (!%p155_p7)
}
  0x11   :  { %s210_s19 = smov 128   ;;  %s211_s20 = smov 8  }
  0x12   :  { %27 = dma.hbm_to_vmem [thread:$0]  %s274_s0, 256, %s22_s10, [#allocation3], %s210_s19, %s210_s19, %s211_s20  }
  0x13   :  { %s212_s23 = smov [#allocation5]   ;;  %s159_s27 = scalar_lea.hbm %s275_s1, 256 }
  0x14   :  { %s39_s24 = sshll.u32 %s212_s23, 4  ;;  %p160_p8 = scmp.ne.s32.totalorder %s275_s1, %s159_s27  ;;  %s40_s24 = int_to_ptr.vmem [resolvable:$true] %s39_s24 }
  0x15   :  { %p163_p9 = scmp.lt.u32.totalorder %s159_s27, %s275_s1 }
  0x17   :  { %p165_p10 = pnand %p163_p9, %p160_p8 }
  0x19   :  { %168 = shalt.err (!%p165_p10)
}
  0x1a   :  { %s169_s4 = scalar_lea.vmem %s40_s24, 256  ;;  %p174_p12 = scmp.lt.s32.totalorder %s40_s24, %s40_s24 }
  0x1b   :  { %p170_p11 = scmp.ne.s32.totalorder %s40_s24, %s169_s4  ;;  %p175_p13 = scmp.lt.s32.totalorder %s169_s4, %s169_s4 }
  0x1d   :  { %p176_p0 = por %p175_p13, %p174_p12 }
  0x1f   :  { %p177_p1 = pnand %p176_p0, %p170_p11 }
  0x21   :  { %180 = shalt.err (!%p177_p1)
}
  0x22   :  { %45 = dma.hbm_to_vmem [thread:$0]  %s275_s1, 256, %s40_s24, [#allocation6], %s210_s19, %s210_s19, %s211_s20  }
  0x23   :  { %203 = dma.done.wait [#allocation3], 256  }
  0x24   :  { %204 = vsyncadd [#allocation3], 4294967040 }
  0x25   :  { %205 = dma.done.wait [#allocation6], 256  }
  0x26   :  { %206 = vsyncadd [#allocation6], 4294967040  ;;  %v66_v0 = vld [vmem:[#allocation2] sm:$0xff]  ;;  %v68_v1 = vld [vmem:[#allocation5] sm:$0xff]  ;;  %s213_s6 = smov [#allocation7]  }
  0x27   :  { %v67_v2 = vld [vmem:[#allocation2 + $0x8] sm:$0xff]  ;;  %v70_v3 = vsub.f32 %v66_v0, %v68_v1  ;;  %v69_v4 = vld [vmem:[#allocation5 + $0x8] sm:$0xff]  ;;  %s114_s7 = sshll.u32 %s213_s6, 4  ;;  %s115_s7 = int_to_ptr.vmem [resolvable:$true] %s114_s7 }
  0x28   :  { %v71_v5 = vsub.f32 %v67_v2, %v69_v4  ;;  %s181_s8 = scalar_lea.vmem %s115_s7, 256  ;;  %p186_p3 = scmp.lt.s32.totalorder %s115_s7, %s115_s7 }
  0x29   :  { %v72_v6 = vand.u32 2147483647, %v70_v3  ;;  %p182_p2 = scmp.ne.s32.totalorder %s115_s7, %s181_s8  ;;  %p187_p4 = scmp.lt.s32.totalorder %s181_s8, %s181_s8 }
  0x2a   :  { %v73_v7 = vand.u32 2147483647, %v71_v5 }
  0x2b   :  { %87 = vst [vmem:[#allocation7] sm:$0xff] %v72_v6  ;;  %p188_p5 = por %p187_p4, %p186_p3 }
  0x2c   :  { %88 = vst [vmem:[#allocation7 + $0x8] sm:$0xff] %v73_v7 }
  0x2d   :  { %p189_p6 = pnand %p188_p5, %p182_p2 }
  0x2f   :  { %192 = shalt.err (!%p189_p6)
}
  0x30   :  { %s193_s10 = scalar_lea.hbm %s276_s2, 256 }
  0x31   :  { %p194_p7 = scmp.ne.s32.totalorder %s276_s2, %s193_s10  ;;  %p197_p8 = scmp.lt.u32.totalorder %s193_s10, %s276_s2 }
  0x33   :  { %p199_p9 = pnand %p197_p8, %p194_p7 }
  0x35   :  { %202 = shalt.err (!%p199_p9)
}
  0x36   :  { %120 = dma.vmem_to_hbm [thread:$0]  %s115_s7, 256, %s276_s2, [#allocation4], %s210_s19, %s210_s19, %s211_s20  }
  0x37   :  { %207 = dma.done.wait [#allocation4], 256  }
  0x38   :  { %208 = vsyncadd [#allocation4], 4294967040 }
  0x39   :  { %124 = vsyncpa [#allocation3], 1 }
  0x3a   :  { %125 = vsyncpa [#allocation6], 1 }
  0x3b   :  { %126 = vsyncpa [#allocation4], 1 }

</bundles_post_ra>
